<compile_context>
chip_gen: v7x
topology: tpu7x:2x2x1
jax: 0.10.0
libtpu: 0.0.40
codegen_flags: <defaults>
</compile_context>

<pallas_src>
import functools

import jax
import jax.numpy as jnp
from jax.experimental import pallas as pl
from jax.experimental.pallas import tpu as pltpu

BN_EPS = 1e-5        # nn.BatchNorm1d default eps
NORM_EPS = 1e-12     # F.normalize default eps

_ROW_ALIGN = 16              # keeps bf16 (16,128) sublane packing and f32 (8,128) tiles legal
_MAX_TILE_ROWS = 4096        # large tiles amortize the ~0.35us per-grid-step overhead
_FUSE_SCRATCH_CAP = 16 << 20 # cap for the fused path's persistent h scratch


def _cdiv(a, b):
    return -(-a // b)


def _round_up(a, b):
    return _cdiv(a, b) * b


def _vmem_limit_bytes():
    """Generation-aware scoped-VMEM limit (v5e/v6e: 128 MiB physical, v7x: 64 MiB)."""
    cap = 128 << 20
    try:
        cap = int(pltpu.get_tpu_info().vmem_capacity_bytes)
    except Exception:
        pass
    return int(max(32 << 20, min(cap * 3 // 4, 100 << 20)))


# --------------------------------------------------------------------------------------
# kernels
# --------------------------------------------------------------------------------------

def _stats_kernel(x_ref, w1_ref, stats_ref, *, n_rows, tile_n):
    """Per-tile partial batch statistics of h = x @ W1 (no bias: it cancels under BN)."""
    i = pl.program_id(0)
    h = jnp.dot(x_ref[...].astype(jnp.bfloat16), w1_ref[...],
                preferred_element_type=jnp.float32)
    # Unconditional row mask: the ragged final tile (and any stale VMEM rows beyond N)
    # must not contribute to the batch statistics.
    row = jax.lax.broadcasted_iota(jnp.int32, h.shape, 0) + i * tile_n
    h = jnp.where(row < n_rows, h, 0.0)
    stats_ref[0:1, 0:1, :] = jnp.sum(h, axis=0, keepdims=True)[None]
    stats_ref[0:1, 1:2, :] = jnp.sum(h * h, axis=0, keepdims=True)[None]


def _apply_kernel(x_ref, w1_ref, bn_ref, w2_ref, b2_ref, o_ref):
    """Recompute h = x @ W1, apply folded BN + ReLU + linear2 + L2 normalize."""
    h = jnp.dot(x_ref[...].astype(jnp.bfloat16), w1_ref[...],
                preferred_element_type=jnp.float32)
    h = jnp.maximum(h * bn_ref[0:1, :] + bn_ref[1:2, :], 0.0)
    y = jnp.dot(h.astype(jnp.bfloat16), w2_ref[...],
                preferred_element_type=jnp.float32) + b2_ref[...]
    ssq = jnp.sum(y * y, axis=1, keepdims=True)
    o_ref[...] = (y * jax.lax.rsqrt(jnp.maximum(ssq, NORM_EPS * NORM_EPS))).astype(o_ref.dtype)


def _fused_kernel(x_ref, w1_ref, gamma_ref, beta_ref, w2_ref, b2_ref, o_ref,
                  h_ref, sum_ref, sq_ref, bn_ref, *, n_rows, tile_n):
    """Single-pass PCHead: phase 0 builds h in VMEM + batch stats; phase 1 applies the head."""
    p = pl.program_id(0)
    i = pl.program_id(1)
    nt = pl.num_programs(1)

    @pl.when(p == 0)
    def _phase0():
        @pl.when(i == 0)
        def _init():
            sum_ref[...] = jnp.zeros_like(sum_ref)
            sq_ref[...] = jnp.zeros_like(sq_ref)

        h = jnp.dot(x_ref[...].astype(jnp.bfloat16), w1_ref[...],
                    preferred_element_type=jnp.float32)
        row = jax.lax.broadcasted_iota(jnp.int32, h.shape, 0) + i * tile_n
        hm = jnp.where(row < n_rows, h, 0.0)          # mask padded / out-of-bounds rows
        sum_ref[...] += jnp.sum(hm, axis=0, keepdims=True)
        sq_ref[...] += jnp.sum(hm * hm, axis=0, keepdims=True)
        h_ref[i] = h.astype(jnp.bfloat16)             # keep h resident: X read once from HBM

        @pl.when(i == nt - 1)
        def _finalize():
            inv_n = jnp.float32(1.0 / n_rows)
            mean = sum_ref[...] * inv_n
            # NOTE: E[h^2]-E[h]^2 in f32 can cancel when |mean| >> std; acceptable for
            # pretraining-scale activations (documented limitation).
            var = jnp.maximum(sq_ref[...] * inv_n - mean * mean, 0.0)
            scale = gamma_ref[...] * jax.lax.rsqrt(var + BN_EPS)
            bn_ref[0:1, :] = scale
            bn_ref[1:2, :] = beta_ref[...] - mean * scale

    @pl.when(p == 1)
    def _phase1():
        h = h_ref[i].astype(jnp.float32)
        h = jnp.maximum(h * bn_ref[0:1, :] + bn_ref[1:2, :], 0.0)
        y = jnp.dot(h.astype(jnp.bfloat16), w2_ref[...],
                    preferred_element_type=jnp.float32) + b2_ref[...]
        ssq = jnp.sum(y * y, axis=1, keepdims=True)
        o_ref[...] = (y * jax.lax.rsqrt(jnp.maximum(ssq, NORM_EPS * NORM_EPS))).astype(o_ref.dtype)


# --------------------------------------------------------------------------------------
# wrapper
# --------------------------------------------------------------------------------------

def pchead_forward(x, params, *, tile_n=None, out_dtype=None, fuse=None):
    """PCHead forward. x: (..., D); returns (N, D) with N = prod(leading dims).

    out_dtype: defaults to x.dtype; pass jnp.bfloat16 to halve the dominant output write.
    fuse:      None = auto (single-pass h-in-VMEM kernel when it fits VMEM), or force True/False.
    """
    d = x.shape[-1]
    h_dim = 2 * d
    x2d = x.reshape(-1, d)                 # no dtype cast, no padding: stream X as-is
    n = x2d.shape[0]
    if n == 0:
        raise ValueError("PCHead forward: empty batch (BatchNorm1d needs N >= 1).")
    out_dtype = x.dtype if out_dtype is None else out_dtype

    w1, b1, gamma, beta, w2, b2 = params
    del b1  # linear1.bias is an exact no-op: train-mode BatchNorm subtracts the batch mean of h
    w1 = jnp.asarray(w1, jnp.bfloat16)     # MXU operands in bf16, f32 accumulation
    w2 = jnp.asarray(w2, jnp.bfloat16)
    assert w1.shape == (d, h_dim) and w2.shape == (h_dim, d), "weights must be (in, out) layout"
    gamma = jnp.asarray(gamma, jnp.float32).reshape(1, h_dim)
    beta = jnp.asarray(beta, jnp.float32).reshape(1, h_dim)
    b2 = jnp.asarray(b2, jnp.float32).reshape(1, d)

    vmem_limit = _vmem_limit_bytes()

    # ---- row tile: as large as the VMEM budget allows, but >= 2 tiles so v7x's two
    # TensorCores both get work on the "parallel" row axis ----
    if tile_n is None:
        tn = min(_MAX_TILE_ROWS, _round_up(_cdiv(n, 2), _ROW_ALIGN))
    else:
        tn = _round_up(max(int(tile_n), _ROW_ALIGN), _ROW_ALIGN)
    row_bytes = d * 28   # rough per-row working set: x tile (2 bufs) + out tile (2 bufs) + f32 h
    tn_cap = max(_ROW_ALIGN,
                 (max(vmem_limit // 3, 4 << 20) // row_bytes) // _ROW_ALIGN * _ROW_ALIGN)
    tn = max(_ROW_ALIGN, min(tn, tn_cap, _round_up(n, _ROW_ALIGN)))
    num_tiles = _cdiv(n, tn)               # ragged final tile; no jnp.pad / output-slice copies

    if fuse is None:
        fuse = num_tiles * tn * h_dim * 2 <= min(_FUSE_SCRATCH_CAP, vmem_limit // 4)

    resident = functools.partial(pl.BlockSpec, pipeline_mode=pl.Buffered(1))

    if fuse:
        # ---- fused single pass: X read once, h kept in VMEM, one kernel launch ----
        last = num_tiles - 1
        return pl.pallas_call(
            functools.partial(_fused_kernel, n_rows=n, tile_n=tn),
            out_shape=jax.ShapeDtypeStruct((n, d), out_dtype),
            grid=(2, num_tiles),
            in_specs=[
                # phase 0: walk the row tiles; phase 1: stay parked on the last tile (no re-read)
                pl.BlockSpec((tn, d), lambda p, i: (i * (1 - p) + last * p, 0)),
                resident((d, h_dim), lambda p, i: (0, 0)),    # w1
                resident((1, h_dim), lambda p, i: (0, 0)),    # gamma
                resident((1, h_dim), lambda p, i: (0, 0)),    # beta
                resident((h_dim, d), lambda p, i: (0, 0)),    # w2
                resident((1, d), lambda p, i: (0, 0)),        # b2
            ],
            # park on output block 0 during phase 0 (never written back), walk tiles in phase 1
            out_specs=pl.BlockSpec((tn, d), lambda p, i: (i * p, 0)),
            scratch_shapes=[
                pltpu.VMEM((num_tiles, tn, h_dim), jnp.bfloat16),  # persistent h = x @ W1
                pltpu.VMEM((1, h_dim), jnp.float32),               # running sum(h)
                pltpu.VMEM((1, h_dim), jnp.float32),               # running sum(h*h)
                pltpu.VMEM((2, h_dim), jnp.float32),               # folded [scale; shift]
            ],
            compiler_params=pltpu.CompilerParams(
                dimension_semantics=("arbitrary", "arbitrary"),
                vmem_limit_bytes=vmem_limit),
        )(x2d, w1, gamma, beta, w2, b2)

    # ---- two-pass fallback (large N): h never touches HBM, both passes use "parallel" rows ----
    cparams = pltpu.CompilerParams(dimension_semantics=("parallel",),
                                   vmem_limit_bytes=vmem_limit)

    stats = pl.pallas_call(
        functools.partial(_stats_kernel, n_rows=n, tile_n=tn),
        out_shape=jax.ShapeDtypeStruct((num_tiles, 2, h_dim), jnp.float32),
        grid=(num_tiles,),
        in_specs=[
            pl.BlockSpec((tn, d), lambda i: (i, 0)),
            resident((d, h_dim), lambda i: (0, 0)),
        ],
        out_specs=pl.BlockSpec((1, 2, h_dim), lambda i: (i, 0, 0)),
        compiler_params=cparams,
    )(x2d, w1)

    # tiny fold (a few KB) in plain JAX: biased variance, gamma/beta -> (scale, shift)
    inv_n = jnp.float32(1.0 / n)
    mean = jnp.sum(stats[:, 0, :], axis=0, keepdims=True) * inv_n
    var = jnp.maximum(jnp.sum(stats[:, 1, :], axis=0, keepdims=True) * inv_n - mean * mean, 0.0)
    scale = gamma * jax.lax.rsqrt(var + BN_EPS)
    bn_affine = jnp.concatenate([scale, beta - mean * scale], axis=0)   # (2, 2D) f32

    return pl.pallas_call(
        _apply_kernel,
        out_shape=jax.ShapeDtypeStruct((n, d), out_dtype),
        grid=(num_tiles,),
        in_specs=[
            pl.BlockSpec((tn, d), lambda i: (i, 0)),
            resident((d, h_dim), lambda i: (0, 0)),   # w1
            resident((2, h_dim), lambda i: (0, 0)),   # [scale; shift]
            resident((h_dim, d), lambda i: (0, 0)),   # w2
            resident((1, d), lambda i: (0, 0)),       # b2
        ],
        out_specs=pl.BlockSpec((tn, d), lambda i: (i, 0)),
        compiler_params=cparams,
    )(x2d, w1, bn_affine, w2, b2)


# --------------------------------------------------------------------------------------
# reference + test
# --------------------------------------------------------------------------------------

def pchead_reference(x, params):
    """Pure-JAX f32 reference matching the PyTorch module (train-mode BN)."""
    w1, b1, gamma, beta, w2, b2 = params
    x2d = x.reshape(-1, x.shape[-1]).astype(jnp.float32)
    h = x2d @ w1 + b1
    mean = jnp.mean(h, axis=0, keepdims=True)
    var = jnp.mean((h - mean) ** 2, axis=0, keepdims=True)
    h = jnp.maximum((h - mean) * jax.lax.rsqrt(var + BN_EPS) * gamma + beta, 0.0)
    y = h @ w2 + b2
    norm = jnp.maximum(jnp.sqrt(jnp.sum(y * y, axis=1, keepdims=True)), NORM_EPS)
    return y / norm


def init_params(key, input_dim):
    """Deterministic synthetic parameters matching PCHead(input_dim) shapes."""
    d, h = input_dim, 2 * input_dim
    k1, k2, k3, k4, k5, k6 = jax.random.split(key, 6)
    # nn.Linear stores weight as (out, in); we pre-transpose to (in, out).
    w1 = jax.random.normal(k1, (d, h), jnp.float32) * 0.05
    b1 = jax.random.normal(k2, (1, h), jnp.float32) * 0.05
    gamma = 1.0 + 0.1 * jax.random.normal(k3, (1, h), jnp.float32)
    beta = 0.1 * jax.random.normal(k4, (1, h), jnp.float32)
    w2 = jax.random.normal(k5, (h, d), jnp.float32) * 0.05
    b2 = jax.random.normal(k6, (1, d), jnp.float32) * 0.05
    return (w1, b1, gamma, beta, w2, b2)


if __name__ == "__main__":
    key = jax.random.PRNGKey(0)
    k_x, k_p = jax.random.split(key)

    input_dim = 128          # D (lane-friendly); hidden = 2D = 256
    batch, seq = 2, 19       # N = 38 rows: multi-tile stats + ragged (unpadded) final tile
    x = jax.random.normal(k_x, (batch, seq, input_dim), jnp.float32)
    params = init_params(k_p, input_dim)
    ref = pchead_reference(x, params)

    def check(out, norm_tol, err_tol):
        out = jax.block_until_ready(out)
        assert out.shape == (batch * seq, input_dim)
        o32 = out.astype(jnp.float32)
        assert bool(jnp.all(jnp.isfinite(o32)))
        norms = jnp.linalg.norm(o32, axis=1)
        max_norm_dev = float(jnp.max(jnp.abs(norms - 1.0)))
        assert max_norm_dev < norm_tol, f"row norms deviate from 1: {max_norm_dev}"
        max_err = float(jnp.max(jnp.abs(o32 - ref)))
        assert max_err < err_tol, f"max abs err vs reference too large: {max_err}"

    # fused single-pass path, small tile -> 3 grid tiles with a ragged final block
    check(pchead_forward(x, params, tile_n=16), 1e-3, 3e-2)
    # forced two-pass path (parallel partial stats + apply), auto tile (2 tiles)
    check(pchead_forward(x, params, fuse=False), 1e-3, 3e-2)
    # bf16 output (halves the dominant output HBM write at the memory roofline)
    check(pchead_forward(x, params, out_dtype=jnp.bfloat16), 6e-3, 5e-2)

    print("KERNEL_OK")
</pallas_src>

<mosaic_0001>
module attributes {stable_mosaic.version = 11 : i64} {
  func.func @_fused_kernel(%arg0: i32, %arg1: i32, %arg2: memref<16x128xf32, #tpu.memory_space<vmem>>, %arg3: memref<128x256xbf16, #tpu.memory_space<vmem>>, %arg4: memref<1x256xf32, #tpu.memory_space<vmem>>, %arg5: memref<1x256xf32, #tpu.memory_space<vmem>>, %arg6: memref<256x128xbf16, #tpu.memory_space<vmem>>, %arg7: memref<1x128xf32, #tpu.memory_space<vmem>>, %arg8: memref<16x128xf32, #tpu.memory_space<vmem>>, %arg9: memref<3x16x256xbf16, #tpu.memory_space<vmem>>, %arg10: memref<1x256xf32, #tpu.memory_space<vmem>>, %arg11: memref<1x256xf32, #tpu.memory_space<vmem>>, %arg12: memref<2x256xf32, #tpu.memory_space<vmem>>) attributes {dimension_semantics = [#tpu.dimension_semantics<arbitrary>, #tpu.dimension_semantics<arbitrary>], iteration_bounds = array<i64: 2, 3>, scalar_prefetch = 0 : i64, scratch_operands = 4 : i64, tpu.core_type = #tpu.core_type<tc>, window_params = [{transform_indices = @transform_0, window_bounds = array<i64: 16, 128>}, {pipeline_mode = #tpu.pipeline_mode<synchronous>, transform_indices = @transform_1, window_bounds = array<i64: 128, 256>}, {pipeline_mode = #tpu.pipeline_mode<synchronous>, transform_indices = @transform_2, window_bounds = array<i64: 1, 256>}, {pipeline_mode = #tpu.pipeline_mode<synchronous>, transform_indices = @transform_3, window_bounds = array<i64: 1, 256>}, {pipeline_mode = #tpu.pipeline_mode<synchronous>, transform_indices = @transform_4, window_bounds = array<i64: 256, 128>}, {pipeline_mode = #tpu.pipeline_mode<synchronous>, transform_indices = @transform_5, window_bounds = array<i64: 1, 128>}, {transform_indices = @transform_6, window_bounds = array<i64: 16, 128>}]} {
    %c0_i32 = arith.constant 0 : i32
    %0 = arith.cmpi eq, %arg0, %c0_i32 : i32
    %1 = arith.extui %0 : i1 to i32
    %c0_i32_0 = arith.constant 0 : i32
    %2 = arith.cmpi ne, %1, %c0_i32_0 : i32
    scf.if %2 {
      %c0_i32_2 = arith.constant 0 : i32
      %6 = arith.cmpi eq, %arg1, %c0_i32_2 : i32
      %7 = arith.extui %6 : i1 to i32
      %c0_i32_3 = arith.constant 0 : i32
      %8 = arith.cmpi ne, %7, %c0_i32_3 : i32
      scf.if %8 {
        %cst_21 = arith.constant 0.000000e+00 : f32
        %40 = vector.broadcast %cst_21 : f32 to vector<1x256xf32>
        %c0_22 = arith.constant 0 : index
        %c0_23 = arith.constant 0 : index
        %41 = vector.load %arg10[%c0_22, %c0_23] : memref<1x256xf32, #tpu.memory_space<vmem>>, vector<1x256xf32>
        tpu.vector_store %arg10[%c0_22, %c0_23], %40 {strides = array<i32>} : memref<1x256xf32, #tpu.memory_space<vmem>>, vector<1x256xf32>,
        %cst_24 = arith.constant 0.000000e+00 : f32
        %42 = vector.broadcast %cst_24 : f32 to vector<1x256xf32>
        %c0_25 = arith.constant 0 : index
        %c0_26 = arith.constant 0 : index
        %43 = vector.load %arg11[%c0_25, %c0_26] : memref<1x256xf32, #tpu.memory_space<vmem>>, vector<1x256xf32>
        tpu.vector_store %arg11[%c0_25, %c0_26], %42 {strides = array<i32>} : memref<1x256xf32, #tpu.memory_space<vmem>>, vector<1x256xf32>,
      } else {
      }
      %c0 = arith.constant 0 : index
      %c0_4 = arith.constant 0 : index
      %9 = vector.load %arg2[%c0, %c0_4] : memref<16x128xf32, #tpu.memory_space<vmem>>, vector<16x128xf32>
      %10 = arith.truncf %9 : vector<16x128xf32> to vector<16x128xbf16>
      %c0_5 = arith.constant 0 : index
      %c0_6 = arith.constant 0 : index
      %11 = vector.load %arg3[%c0_5, %c0_6] : memref<128x256xbf16, #tpu.memory_space<vmem>>, vector<128x256xbf16>
      %cst = arith.constant dense<0.000000e+00> : vector<16x256xf32>
      %12 = tpu.matmul %10, %11, %cst {dimension_numbers = #tpu.dot_dimension_numbers<[1], [0], [0], [1], [0, 0, 1, 1], [], []>} : vector<16x128xbf16>, vector<128x256xbf16>, vector<16x256xf32> -> vector<16x256xf32>
      %13 = tpu.iota {dimensions = array<i32: 0>} : vector<16x256xi32>
      %c16_i32 = arith.constant 16 : i32
      %14 = arith.muli %arg1, %c16_i32 : i32
      %15 = vector.broadcast %14 : i32 to vector<16x256xi32>
      %16 = arith.addi %13, %15 : vector<16x256xi32>
      %c38_i32 = arith.constant 38 : i32
      %17 = vector.broadcast %c38_i32 : i32 to vector<16x256xi32>
      %18 = arith.cmpi slt, %16, %17 : vector<16x256xi32>
      %cst_7 = arith.constant 0.000000e+00 : f32
      %19 = vector.broadcast %cst_7 : f32 to vector<16x256xf32>
      %20 = arith.select %18, %12, %19 : vector<16x256xi1>, vector<16x256xf32>
      %c0_8 = arith.constant 0 : index
      %c0_9 = arith.constant 0 : index
      %21 = vector.load %arg10[%c0_8, %c0_9] : memref<1x256xf32, #tpu.memory_space<vmem>>, vector<1x256xf32>
      %cst_10 = arith.constant dense<0.000000e+00> : vector<256xf32>
      %22 = vector.multi_reduction <add>, %20, %cst_10 [0] : vector<16x256xf32> to vector<256xf32>
      %23 = vector.shape_cast %22 : vector<256xf32> to vector<1x256xf32>
      %24 = arith.addf %21, %23 : vector<1x256xf32>
      %c0_11 = arith.constant 0 : index
      %c0_12 = arith.constant 0 : index
      %25 = vector.load %arg10[%c0_11, %c0_12] : memref<1x256xf32, #tpu.memory_space<vmem>>, vector<1x256xf32>
      tpu.vector_store %arg10[%c0_11, %c0_12], %24 {strides = array<i32>} : memref<1x256xf32, #tpu.memory_space<vmem>>, vector<1x256xf32>,
      %c0_13 = arith.constant 0 : index
      %c0_14 = arith.constant 0 : index
      %26 = vector.load %arg11[%c0_13, %c0_14] : memref<1x256xf32, #tpu.memory_space<vmem>>, vector<1x256xf32>
      %27 = arith.mulf %20, %20 : vector<16x256xf32>
      %cst_15 = arith.constant dense<0.000000e+00> : vector<256xf32>
      %28 = vector.multi_reduction <add>, %27, %cst_15 [0] : vector<16x256xf32> to vector<256xf32>
      %29 = vector.shape_cast %28 : vector<256xf32> to vector<1x256xf32>
      %30 = arith.addf %26, %29 : vector<1x256xf32>
      %c0_16 = arith.constant 0 : index
      %c0_17 = arith.constant 0 : index
      %31 = vector.load %arg11[%c0_16, %c0_17] : memref<1x256xf32, #tpu.memory_space<vmem>>, vector<1x256xf32>
      tpu.vector_store %arg11[%c0_16, %c0_17], %30 {strides = array<i32>} : memref<1x256xf32, #tpu.memory_space<vmem>>, vector<1x256xf32>,
      %32 = arith.truncf %12 : vector<16x256xf32> to vector<16x256xbf16>
      %33 = arith.index_cast %arg1 : i32 to index
      %c0_18 = arith.constant 0 : index
      %c0_19 = arith.constant 0 : index
      %34 = vector.load %arg9[%33, %c0_18, %c0_19] : memref<3x16x256xbf16, #tpu.memory_space<vmem>>, vector<1x16x256xbf16>
      %35 = vector.shape_cast %34 : vector<1x16x256xbf16> to vector<16x256xbf16>
      %36 = vector.shape_cast %32 : vector<16x256xbf16> to vector<1x16x256xbf16>
      tpu.vector_store %arg9[%33, %c0_18, %c0_19], %36 {strides = array<i32>} : memref<3x16x256xbf16, #tpu.memory_space<vmem>>, vector<1x16x256xbf16>,
      %c2_i32 = arith.constant 2 : i32
      %37 = arith.cmpi eq, %arg1, %c2_i32 : i32
      %38 = arith.extui %37 : i1 to i32
      %c0_i32_20 = arith.constant 0 : i32
      %39 = arith.cmpi ne, %38, %c0_i32_20 : i32
      scf.if %39 {
        %c0_21 = arith.constant 0 : index
        %c0_22 = arith.constant 0 : index
        %40 = vector.load %arg10[%c0_21, %c0_22] : memref<1x256xf32, #tpu.memory_space<vmem>>, vector<1x256xf32>
        %cst_23 = arith.constant 0.0263157897 : f32
        %41 = vector.broadcast %cst_23 : f32 to vector<1x256xf32>
        %42 = arith.mulf %40, %41 : vector<1x256xf32>
        %c0_24 = arith.constant 0 : index
        %c0_25 = arith.constant 0 : index
        %43 = vector.load %arg11[%c0_24, %c0_25] : memref<1x256xf32, #tpu.memory_space<vmem>>, vector<1x256xf32>
        %cst_26 = arith.constant 0.0263157897 : f32
        %44 = vector.broadcast %cst_26 : f32 to vector<1x256xf32>
        %45 = arith.mulf %43, %44 : vector<1x256xf32>
        %46 = arith.mulf %42, %42 : vector<1x256xf32>
        %47 = arith.subf %45, %46 : vector<1x256xf32>
        %cst_27 = arith.constant 0.000000e+00 : f32
        %48 = vector.broadcast %cst_27 : f32 to vector<1x256xf32>
        %49 = arith.maximumf %47, %48 : vector<1x256xf32>
        %c0_28 = arith.constant 0 : index
        %c0_29 = arith.constant 0 : index
        %50 = vector.load %arg4[%c0_28, %c0_29] : memref<1x256xf32, #tpu.memory_space<vmem>>, vector<1x256xf32>
        %cst_30 = arith.constant 9.99999974E-6 : f32
        %51 = vector.broadcast %cst_30 : f32 to vector<1x256xf32>
        %52 = arith.addf %49, %51 : vector<1x256xf32>
        %53 = math.rsqrt %52 : vector<1x256xf32>
        %54 = arith.mulf %50, %53 : vector<1x256xf32>
        %c0_31 = arith.constant 0 : index
        %c0_32 = arith.constant 0 : index
        %55 = vector.load %arg12[%c0_31, %c0_32] : memref<2x256xf32, #tpu.memory_space<vmem>>, vector<1x256xf32>
        tpu.vector_store %arg12[%c0_31, %c0_32], %54 {strides = array<i32>} : memref<2x256xf32, #tpu.memory_space<vmem>>, vector<1x256xf32>,
        %c0_33 = arith.constant 0 : index
        %c0_34 = arith.constant 0 : index
        %56 = vector.load %arg5[%c0_33, %c0_34] : memref<1x256xf32, #tpu.memory_space<vmem>>, vector<1x256xf32>
        %57 = arith.mulf %42, %54 : vector<1x256xf32>
        %58 = arith.subf %56, %57 : vector<1x256xf32>
        %c1 = arith.constant 1 : index
        %c0_35 = arith.constant 0 : index
        %59 = vector.load %arg12[%c1, %c0_35] : memref<2x256xf32, #tpu.memory_space<vmem>>, vector<1x256xf32>
        tpu.vector_store %arg12[%c1, %c0_35], %58 {strides = array<i32>} : memref<2x256xf32, #tpu.memory_space<vmem>>, vector<1x256xf32>,
      } else {
      }
    } else {
    }
    %c1_i32 = arith.constant 1 : i32
    %3 = arith.cmpi eq, %arg0, %c1_i32 : i32
    %4 = arith.extui %3 : i1 to i32
    %c0_i32_1 = arith.constant 0 : i32
    %5 = arith.cmpi ne, %4, %c0_i32_1 : i32
    scf.if %5 {
      %6 = arith.index_cast %arg1 : i32 to index
      %c0 = arith.constant 0 : index
      %c0_2 = arith.constant 0 : index
      %7 = vector.load %arg9[%6, %c0, %c0_2] : memref<3x16x256xbf16, #tpu.memory_space<vmem>>, vector<1x16x256xbf16>
      %8 = vector.shape_cast %7 : vector<1x16x256xbf16> to vector<16x256xbf16>
      %9 = arith.extf %8 : vector<16x256xbf16> to vector<16x256xf32>
      %c0_3 = arith.constant 0 : index
      %c0_4 = arith.constant 0 : index
      %10 = vector.load %arg12[%c0_3, %c0_4] : memref<2x256xf32, #tpu.memory_space<vmem>>, vector<1x256xf32>
      %11 = vector.broadcast %10 : vector<1x256xf32> to vector<16x256xf32>
      %12 = arith.mulf %9, %11 : vector<16x256xf32>
      %c1 = arith.constant 1 : index
      %c0_5 = arith.constant 0 : index
      %13 = vector.load %arg12[%c1, %c0_5] : memref<2x256xf32, #tpu.memory_space<vmem>>, vector<1x256xf32>
      %14 = vector.broadcast %13 : vector<1x256xf32> to vector<16x256xf32>
      %15 = arith.addf %12, %14 : vector<16x256xf32>
      %cst = arith.constant 0.000000e+00 : f32
      %16 = vector.broadcast %cst : f32 to vector<16x256xf32>
      %17 = arith.maximumf %15, %16 : vector<16x256xf32>
      %18 = arith.truncf %17 : vector<16x256xf32> to vector<16x256xbf16>
      %c0_6 = arith.constant 0 : index
      %c0_7 = arith.constant 0 : index
      %19 = vector.load %arg6[%c0_6, %c0_7] : memref<256x128xbf16, #tpu.memory_space<vmem>>, vector<256x128xbf16>
      %cst_8 = arith.constant dense<0.000000e+00> : vector<16x128xf32>
      %20 = tpu.matmul %18, %19, %cst_8 {dimension_numbers = #tpu.dot_dimension_numbers<[1], [0], [0], [1], [0, 0, 1, 1], [], []>} : vector<16x256xbf16>, vector<256x128xbf16>, vector<16x128xf32> -> vector<16x128xf32>
      %c0_9 = arith.constant 0 : index
      %c0_10 = arith.constant 0 : index
      %21 = vector.load %arg7[%c0_9, %c0_10] : memref<1x128xf32, #tpu.memory_space<vmem>>, vector<1x128xf32>
      %22 = vector.broadcast %21 : vector<1x128xf32> to vector<16x128xf32>
      %23 = arith.addf %20, %22 : vector<16x128xf32>
      %24 = arith.mulf %23, %23 : vector<16x128xf32>
      %cst_11 = arith.constant dense<0.000000e+00> : vector<16xf32>
      %25 = vector.multi_reduction <add>, %24, %cst_11 [1] : vector<16x128xf32> to vector<16xf32>
      %26 = vector.shape_cast %25 : vector<16xf32> to vector<16x1xf32>
      %cst_12 = arith.constant 1.000000e-24 : f32
      %27 = vector.broadcast %cst_12 : f32 to vector<16x1xf32>
      %28 = arith.maximumf %26, %27 : vector<16x1xf32>
      %29 = math.rsqrt %28 : vector<16x1xf32>
      %30 = vector.broadcast %29 : vector<16x1xf32> to vector<16x128xf32>
      %31 = arith.mulf %23, %30 : vector<16x128xf32>
      %c0_13 = arith.constant 0 : index
      %c0_14 = arith.constant 0 : index
      %32 = vector.load %arg8[%c0_13, %c0_14] : memref<16x128xf32, #tpu.memory_space<vmem>>, vector<16x128xf32>
      tpu.vector_store %arg8[%c0_13, %c0_14], %31 {strides = array<i32>} : memref<16x128xf32, #tpu.memory_space<vmem>>, vector<16x128xf32>,
    } else {
    }
    return
  }
  func.func @transform_0(%arg0: i32, %arg1: i32) -> (i32, i32) {
    %c1_i32 = arith.constant 1 : i32
    %0 = arith.subi %c1_i32, %arg0 : i32
    %1 = arith.muli %arg1, %0 : i32
    %c2_i32 = arith.constant 2 : i32
    %2 = arith.muli %c2_i32, %arg0 : i32
    %3 = arith.addi %1, %2 : i32
    %c0_i32 = arith.constant 0 : i32
    %c0_i32_0 = arith.constant 0 : i32
    return %3, %c0_i32 : i32, i32
  }
  func.func @transform_1(%arg0: i32, %arg1: i32) -> (i32, i32) {
    %c0_i32 = arith.constant 0 : i32
    %c0_i32_0 = arith.constant 0 : i32
    %c0_i32_1 = arith.constant 0 : i32
    return %c0_i32, %c0_i32_0 : i32, i32
  }
  func.func @transform_2(%arg0: i32, %arg1: i32) -> (i32, i32) {
    %c0_i32 = arith.constant 0 : i32
    %c0_i32_0 = arith.constant 0 : i32
    %c0_i32_1 = arith.constant 0 : i32
    return %c0_i32, %c0_i32_0 : i32, i32
  }
  func.func @transform_3(%arg0: i32, %arg1: i32) -> (i32, i32) {
    %c0_i32 = arith.constant 0 : i32
    %c0_i32_0 = arith.constant 0 : i32
    %c0_i32_1 = arith.constant 0 : i32
    return %c0_i32, %c0_i32_0 : i32, i32
  }
  func.func @transform_4(%arg0: i32, %arg1: i32) -> (i32, i32) {
    %c0_i32 = arith.constant 0 : i32
    %c0_i32_0 = arith.constant 0 : i32
    %c0_i32_1 = arith.constant 0 : i32
    return %c0_i32, %c0_i32_0 : i32, i32
  }
  func.func @transform_5(%arg0: i32, %arg1: i32) -> (i32, i32) {
    %c0_i32 = arith.constant 0 : i32
    %c0_i32_0 = arith.constant 0 : i32
    %c0_i32_1 = arith.constant 0 : i32
    return %c0_i32, %c0_i32_0 : i32, i32
  }
  func.func @transform_6(%arg0: i32, %arg1: i32) -> (i32, i32) {
    %0 = arith.muli %arg1, %arg0 : i32
    %c0_i32 = arith.constant 0 : i32
    %c0_i32_0 = arith.constant 0 : i32
    return %0, %c0_i32 : i32, i32
  }
}

</mosaic_0001>

<bundles_post_ra>
// kernel: tpu_custom_call.1
= control target key start
LH: loop header
LB: loop body
LE: loop exit
PB: predicated region body
PF: predicated region fallthrough
CT: control target
= control target key end

     0   :  { %s2159_s0 = inlined_call_operand.hbm [shape: f32[38,128], index: 0, kind: input, shape index: {}]   ;;  %s2160_s1 = inlined_call_operand.hbm [shape: bf16[128,256], index: 1, kind: input, shape index: {}]   ;;  %s2161_s2 = inlined_call_operand.hbm [shape: f32[1,256], index: 2, kind: input, shape index: {}]   ;;  %s2162_s3 = inlined_call_operand.hbm [shape: f32[1,256], index: 3, kind: input, shape index: {}]   ;;  %s2163_s4 = inlined_call_operand.hbm [shape: bf16[256,128], index: 4, kind: input, shape index: {}]   ;;  %s2164_s5 = inlined_call_operand.hbm [shape: f32[1,128], index: 5, kind: input, shape index: {}]   ;;  %s2165_s6 = inlined_call_operand.hbm [shape: f32[38,128], index: 6, kind: output, shape index: {}]  }
   0x1   :  { %2182 = sst [smem:[#allocation35_spill]] %s2165_s6 }
   0x2   :  { %11 = vsyncpa [#allocation7], 0 }
   0x3   :  { %13 = vsyncpa [#allocation7 + $0x1], 0 }
   0x4   :  { %14 = vsyncpa [#allocation10], 0 }
   0x5   :  { %15 = vsyncpa [#allocation13], 0 }
   0x6   :  { %16 = vsyncpa [#allocation16], 0 }
   0x7   :  { %17 = vsyncpa [#allocation8], 0 }
   0x8   :  { %19 = vsyncpa [#allocation8 + $0x1], 0  ;;  %s1725_s21 = smov 0   ;;  %s1727_s22 = smov 0  }
   0x9   :  { %s1729_s23 = smov 0   ;;  %s1731_s24 = smov 0  }
   0xa   :  { %s1733_s25 = smov 0   ;;  %s1735_s26 = smov 0  }
   0xb   :  { %s1737_s27 = smov 0   ;;  %s1739_s28 = smov 0  }
   0xc   :  { %s1741_s29 = smov 0   ;;  %s1743_s30 = smov 0  }
   0xd   :  { %s1745_s7 = smov 0  }
   0xe LB: > { %2183 = sst [smem:[#allocation23_spill]] %s1638_s23  ;;  %s2166_s8 = sadd.s32 4294967295, %s1670_s7   ;;  %s1670_s7 = sphi %s1745_s7, %s25_s7   ;;  %s1666_s30 = sphi %s1743_s30, %s2232_s30   ;;  %s1662_s29 = sphi %s1741_s29, %s2231_s29   ;;  %s1658_s28 = sphi %s1739_s28, %s2237_s28   ;;  %s1654_s27 = sphi %s1737_s27, %s2229_s27   ;;  %s1650_s26 = sphi %s1735_s26, %s2236_s26   ;;  %s1646_s25 = sphi %s1733_s25, %s2235_s25   ;;  %s1642_s24 = sphi %s1731_s24, %s2227_s24   ;;  %s1638_s23 = sphi %s1729_s23, %s2226_s23   ;;  %s1634_s22 = sphi %s1727_s22, %s2234_s22   ;;  %s1630_s21 = sphi %s1725_s21, %s2233_s21  }
   0xf   : > { %2184 = sst [smem:[#allocation24_spill]] %s1646_s25  ;;  %s34_s10 = sadd.s32 1, %s1662_s29 }
  0x10   : > { %2185 = sst [smem:[#allocation25_spill]] %s1654_s27  ;;  %s37_s11 = sadd.s32 1, %s1666_s30 }
  0x11   : > { %2186 = sst [smem:[#allocation26_spill]] %s1658_s28  ;;  %p35_p0 = scmp.ge.s32.totalorder %s34_s10, 3 }
  0x12   : > { %2187 = sst [smem:[#allocation27_spill]] %s1662_s29  ;;  %s41_s12 = ssub.s32 1, %s1666_s30 }
  0x13   : > { %2188 = sst [smem:[#allocation28_spill]] %s1666_s30  ;;  %s42_s13 = smul.u32 %s1662_s29, %s41_s12 }
  0x14   : > { %s1063_s14 = sshll.u32 %s1666_s30, 1  ;;  %s2239_s10 = smov (%p35_p0, %s34_s10), 0 }
  0x15   : > { %2189 = sst [smem:[#allocation29_spill]] %s2239_s10  ;;  %s2241_s11 = smov (!%p35_p0, %s37_s11), %s1666_s30 }
  0x16   : > { %s1790_s15 = sadd.s32 %s1063_s14, %s42_s13  ;;  %s52_s16 = sadd.s32 1, %s1650_s26 }
  0x17   : > { %p39_p1 = scmp.ge.s32.totalorder %s2241_s11, 2  ;;  %p59_p2 = scmp.ne.s32.totalorder %s1650_s26, %s1646_s25 }
  0x18   : > { %p60_p3 = scmp.eq.s32.totalorder %s1670_s7, 0  ;;  %p65_p4 = scmp.ne.s32.totalorder %s1646_s25, %s1642_s24 }
  0x19   : > { %s2243_s11 = smov (%p39_p1, %s2241_s11), 0  ;;  %p1806_p6 = scmp.eq.s32.totalorder %s2166_s8, 0 }
  0x1a   : > { %2190 = sst [smem:[#allocation30_spill]] %s2243_s11  ;;  %p1800_p5 = por %p60_p3, %p59_p2 }
  0x1b   : > { %s2192_s18 = scalar_select %p1806_p6, 1, 0 }
  0x1c   : > { %s2191_s17 = scalar_select %p1800_p5, 1, 0 }
  0x1d   : > { %s45_s19 = ssub.s32 1, %s2243_s11  ;;  %s1064_s20 = sshll.u32 %s2243_s11, 1 }
  0x1e   : > { %s46_s24 = smul.u32 %s45_s19, %s2239_s10  ;;  %p1815_p7 = por %p1806_p6, %p65_p4 }
  0x1f   : > { %s180_s13 = smul.u32 %s1662_s29, %s1666_s30  ;;  %s185_s14 = sadd.s32 1, %s1638_s23 }
  0x20   : > { %s2193_s12 = scalar_select %p1815_p7, 1, 0 }
  0x21   : > { %s48_s9 = sadd.s32 %s1064_s20, %s46_s24  ;;  %s181_s8 = smul.u32 %s2243_s11, %s2239_s10 }
  0x22   : > { %2194 = sst [smem:[#allocation31_spill]] %s2193_s12  ;;  %s49_s6 = ssub.s32 %s1790_s15, %s48_s9 }
  0x23   : > { %p195_p8 = scmp.ne.s32.totalorder %s1638_s23, %s1634_s22  ;;  %p50_p9 = scmp.eq.s32.totalorder %s49_s6, 0 }
  0x24   : > { %s182_s27 = ssub.s32 %s180_s13, %s181_s8  ;;  %s2195_s28 = sadd.s32 4294967295, %s1670_s7  }
  0x25   : > { %p183_p10 = scmp.eq.s32.totalorder %s182_s27, 0  ;;  %p196_p11 = scmp.eq.s32.totalorder %s2195_s28, 5 }
  0x26   : > { %s1830_s19 = scalar_select %p50_p9, %s1650_s26, %s52_s16  }
  0x27   : > { %s1833_s25 = scalar_select %p183_p10, %s1638_s23, %s185_s14  }
  0x28   : > { %2196 = sst [smem:[#allocation32_spill]] %s1830_s19  ;;  %p1835_p12 = por %p196_p11, %p195_p8 }
  0x29   : > { %2197 = sst [smem:[#allocation33_spill]] %s1833_s25  ;;  %p201_p13 = scmp.ne.s32.totalorder %s1634_s22, %s1630_s21 }
  0x2a   : > { %s2198_s12 = scalar_select %p1835_p12, 1, 0 }
  0x2b   : > { %s2199_s30 = sadd.s32 4294967294, %s1670_s7   ;;  %p1065_p1 = scmp.ge.s32.totalorder %s1670_s7, 1 }
  0x2c   : > { %p202_p0 = scmp.eq.s32.totalorder %s2199_s30, 5  ;;  %p209_p2 = scmp.lt.s32.totalorder %s1670_s7, 7 }
  0x2d   : > { %s1672_s28 = smov [#allocation9]   ;;  %s1673_s9 = smov [#allocation12]  }
  0x2e   : > { %p1845_p3 = por %p202_p0, %p201_p13  ;;  %p1849_p4 = pnand %p1065_p1, %p209_p2 }
  0x2f   : > { %s221_s8 = sshll.u32 %s1672_s28, 4  ;;  %s246_s16 = sshll.u32 %s1673_s9, 4  ;;  %s1853_s8 = int_to_ptr.vmem [resolvable:$true] %s221_s8  ;;  %s1863_s16 = int_to_ptr.vmem [resolvable:$true] %s246_s16 }
  0x30   : > { %s2200_s6 = scalar_select %p1845_p3, 1, 0 }
  0x31   : > { %s2202_s27 = scalar_select %p1849_p4, 1, 0 }
  0x32   : > { %2201 = sst [smem:[#allocation34_spill]] %s2200_s6  ;;  %p1187_p8 = pneg %p1849_p4 }
  0x33   : > { %s1674_s20 = smov [#allocation11]   ;;  %s1368_s28 = scalar_lea.hbm %s2160_s1, 2048 }
  0x34   : > { %p1859_p9 = pnand %p1187_p8, %p1806_p6  ;;  %s235_s24 = sshll.u32 %s1674_s20, 4  ;;  %s1865_s24 = int_to_ptr.vmem [resolvable:$true] %s235_s24 }
  0x35   : > { %p1369_p10 = scmp.ne.s32.totalorder %s2160_s1, %s1368_s28  ;;  %p1375_p1 = scmp.lt.u32.totalorder %s1368_s28, %s2160_s1 }
  0x36   : > { %p1875_p11 = pneg %p1859_p9 }
  0x38   : > { %p1371_p13 = pnand %p1875_p11, %p1369_p10 }
  0x3a   : > { %p1372_p0 = pneg %p1371_p13 }
  0x3c   : > { %p1377_p2 = pnand %p1375_p1, %p1372_p0 }
  0x3e   : > { %1380 = shalt.err (!%p1377_p2)
}
  0x3f   : > { %s1381_s10 = scalar_lea.vmem %s1853_s8, 2048  ;;  %p1389_p6 = scmp.lt.s32.totalorder %s1853_s8, %s1853_s8 }
  0x40   : > { %p1382_p8 = scmp.ne.s32.totalorder %s1853_s8, %s1381_s10  ;;  %p1390_p7 = scmp.lt.s32.totalorder %s1381_s10, %s1381_s10 }
  0x42   : > { %p1384_p3 = pnand %p1382_p8, %p1875_p11  ;;  %p1391_p10 = por %p1390_p7, %p1389_p6 }
  0x44   : > { %p1385_p12 = pneg %p1384_p3 }
  0x46   : > { %p1392_p13 = pnand %p1391_p10, %p1385_p12 }
  0x48   : > { %1395 = shalt.err (!%p1392_p13)
}
  0x49   : > { %s1675_s11 = smov 128   ;;  %s1676_s13 = smov 8  }
  0x4a   : > { %1190 = dma.hbm_to_vmem [thread:$0]  (!%p1859_p9), %s2160_s1, 2048, %s1853_s8, [#allocation10], %s1675_s11, %s1675_s11, %s1676_s13  }
  0x4b   : > { %s1396_s19 = scalar_lea.hbm %s2162_s3, 32 }
  0x4c   : > { %p1397_p6 = scmp.ne.s32.totalorder %s2162_s3, %s1396_s19  ;;  %p1403_p3 = scmp.lt.u32.totalorder %s1396_s19, %s2162_s3 }
  0x4e   : > { %p1399_p7 = pnand %p1397_p6, %p1875_p11 }
  0x50   : > { %p1400_p12 = pneg %p1399_p7 }
  0x52   : > { %p1405_p0 = pnand %p1403_p3, %p1400_p12 }
  0x54   : > { %1408 = shalt.err (!%p1405_p0)
}
  0x55   : > { %s1409_s8 = scalar_lea.vmem %s1863_s16, 32  ;;  %p1417_p10 = scmp.lt.s32.totalorder %s1863_s16, %s1863_s16 }
  0x56   : > { %p1410_p1 = scmp.ne.s32.totalorder %s1863_s16, %s1409_s8  ;;  %p1418_p13 = scmp.lt.s32.totalorder %s1409_s8, %s1409_s8 }
  0x58   : > { %p1412_p2 = pnand %p1410_p1, %p1875_p11  ;;  %p1419_p6 = por %p1418_p13, %p1417_p10 }
  0x5a   : > { %p1413_p8 = pneg %p1412_p2 }
  0x5c   : > { %p1420_p7 = pnand %p1419_p6, %p1413_p8 }
  0x5e   : > { %1423 = shalt.err (!%p1420_p7)
}
  0x5f   : > { %1196 = dma.hbm_to_vmem [thread:$0]  (!%p1859_p9), %s2162_s3, 32, %s1863_s16, [#allocation13]  }
  0x60   : > { %s1424_s11 = scalar_lea.hbm %s2161_s2, 32 }
  0x61   : > { %p1425_p12 = scmp.ne.s32.totalorder %s2161_s2, %s1424_s11  ;;  %p1431_p1 = scmp.lt.u32.totalorder %s1424_s11, %s2161_s2 }
  0x63   : > { %p1427_p3 = pnand %p1425_p12, %p1875_p11 }
  0x65   : > { %p1428_p0 = pneg %p1427_p3 }
  0x67   : > { %p1433_p2 = pnand %p1431_p1, %p1428_p0 }
  0x69   : > { %1436 = shalt.err (!%p1433_p2)
}
  0x6a   : > { %s1437_s16 = scalar_lea.vmem %s1865_s24, 32  ;;  %p1445_p6 = scmp.lt.s32.totalorder %s1865_s24, %s1865_s24 }
  0x6b   : > { %p1438_p8 = scmp.ne.s32.totalorder %s1865_s24, %s1437_s16  ;;  %p1446_p7 = scmp.lt.s32.totalorder %s1437_s16, %s1437_s16 }
  0x6d   : > { %p1440_p10 = pnand %p1438_p8, %p1875_p11  ;;  %p1447_p12 = por %p1446_p7, %p1445_p6 }
  0x6f   : > { %p1441_p13 = pneg %p1440_p10 }
  0x71   : > { %p1448_p3 = pnand %p1447_p12, %p1441_p13 }
  0x73   : > { %1451 = shalt.err (!%p1448_p3)
}
  0x74   : > { %1193 = dma.hbm_to_vmem [thread:$0]  (!%p1859_p9), %s2161_s2, 32, %s1865_s24, [#allocation10]  }
  0x75   : > { %s1677_s8 = smov [#allocation14]   ;;  %s1452_s6 = scalar_lea.hbm %s2163_s4, 2048 }
  0x76   : > { %s256_s23 = sshll.u32 %s1677_s8, 4  ;;  %p1453_p0 = scmp.ne.s32.totalorder %s2163_s4, %s1452_s6  ;;  %s257_s23 = int_to_ptr.vmem [resolvable:$true] %s256_s23 }
  0x77   : > { %p1459_p8 = scmp.lt.u32.totalorder %s1452_s6, %s2163_s4 }
  0x78   : > { %p1455_p1 = pnand %p1453_p0, %p1875_p11 }
  0x7a   : > { %p1456_p2 = pneg %p1455_p1 }
  0x7c   : > { %p1461_p10 = pnand %p1459_p8, %p1456_p2 }
  0x7e   : > { %1464 = shalt.err (!%p1461_p10)
}
  0x7f   : > { %s1465_s24 = scalar_lea.vmem %s257_s23, 2048  ;;  %p1473_p12 = scmp.lt.s32.totalorder %s257_s23, %s257_s23 }
  0x80   : > { %p1466_p13 = scmp.ne.s32.totalorder %s257_s23, %s1465_s24  ;;  %p1474_p3 = scmp.lt.s32.totalorder %s1465_s24, %s1465_s24 }
  0x82   : > { %p1468_p6 = pnand %p1466_p13, %p1875_p11  ;;  %p1475_p4 = por %p1474_p3, %p1473_p12 }
  0x84   : > { %p1469_p7 = pneg %p1468_p6 }
  0x86   : > { %p1476_p5 = pnand %p1475_p4, %p1469_p7 }
  0x88   : > { %1479 = shalt.err (!%p1476_p5)
}
  0x89   : > { %s1678_s9 = smov 64   ;;  %s1679_s16 = smov 4  }
  0x8a   : > { %1199 = dma.hbm_to_vmem [thread:$0]  (!%p1859_p9), %s2163_s4, 2048, %s257_s23, [#allocation13], %s1678_s9, %s1678_s9, %s1679_s16  }
  0x8b   : > { %s1680_s8 = smov [#allocation15]   ;;  %s1480_s11 = scalar_lea.hbm %s2164_s5, 16 }
  0x8c   : > { %s270_s25 = sshll.u32 %s1680_s8, 4  ;;  %p1481_p5 = scmp.ne.s32.totalorder %s2164_s5, %s1480_s11  ;;  %s271_s25 = int_to_ptr.vmem [resolvable:$true] %s270_s25 }
  0x8d   : > { %p1487_p1 = scmp.lt.u32.totalorder %s1480_s11, %s2164_s5 }
  0x8e   : > { %p1483_p4 = pnand %p1481_p5, %p1875_p11 }
  0x90   : > { %p1484_p0 = pneg %p1483_p4 }
  0x92   : > { %p1489_p2 = pnand %p1487_p1, %p1484_p0 }
  0x94   : > { %1492 = shalt.err (!%p1489_p2)
}
  0x95   : > { %s1493_s23 = scalar_lea.vmem %s271_s25, 16  ;;  %s1500_s9 = scalar_lea.vmem %s271_s25, 32 }
  0x96   : > { %p1494_p8 = scmp.ne.s32.totalorder %s271_s25, %s1493_s23  ;;  %p1501_p6 = scmp.lt.s32.totalorder %s271_s25, %s271_s25 }
  0x97   : > { %p1502_p7 = scmp.lt.s32.totalorder %s1500_s9, %s1493_s23 }
  0x98   : > { %p1496_p10 = pnand %p1494_p8, %p1875_p11 }
  0x99   : > { %p1503_p12 = por %p1502_p7, %p1501_p6 }
  0x9a   : > { %p1497_p13 = pneg %p1496_p10 }
  0x9c   : > { %p1504_p3 = pnand %p1503_p12, %p1497_p13 }
  0x9e   : > { %1507 = shalt.err (!%p1504_p3)
}
  0x9f   : > { %1202 = dma.hbm_to_vmem [thread:$0]  (!%p1859_p9), %s2164_s5, 16, %s271_s25, [#allocation16]  }
  0xa0   : > { %p1071_p5 = scmp.ge.s32.totalorder %s1670_s7, 6 }
  0xa1   : > { %p2205_p4 = scmp.ne.s32.totalorder (!%p1071_p5), %s2191_s17, 0 }
  0xa2   : > { %277 = sbr.rel (%p1071_p5) target bundleno = 204 (0xcc), region = 36 }
  0xa9   : > { %280 = sbr.rel (!%p2205_p4) target bundleno = 204 (0xcc), region = 40  ;;  %s281_s29 = sand.u32 (%p2205_p4), 1, %s1650_s26  }
  0xaa   : > { %s1074_s10 = sshll.u32 (%p2205_p4), %s1790_s15, 1  ;;  %s1072_s8 = sshll.u32 (%p2205_p4), %s281_s29, 4 }
  0xab   : > { %s291_s19 = ssub.s32 (%p2205_p4), 5, %s1074_s10  ;;  %s1986_s11 = scalar_lea.sflag (%p2205_p4), [#allocation7], %s281_s29 }
  0xac   : > { %p292_p11 = scmp.lt.s32.totalorder (%p2205_p4), %s291_s19, 2  ;;  %s285_s25 = scalar_lea.vmem (%p2205_p4), [#allocation6], %s1072_s8 }
  0xb0   : > { %s2245_s19 = smov (!%p292_p11, %s291_s19), 2 }
  0xb1   : > { %s1983_s6 = sshll.u32 %s2245_s19, 7 }
  0xb2   : > { %s296_s30 = ssub.s32 256, %s1983_s6 }
  0xb3   : > { %297 = vsyncadd %s1986_s11, %s296_s30  ;;  %p1076_p9 = scmp.ne.s32.totalorder %s1983_s6, 0  ;;  %s1139_s17 = sshll.u32 %s1790_s15, 8 }
  0xb4   : > { %s1994_s28 = scalar_lea.hbm %s2159_s0, %s1139_s17  ;;  %s302_s24 = sshll.u32 %s285_s25, 4  ;;  %s1996_s24 = int_to_ptr.vmem [resolvable:$true] %s302_s24 }
  0xb5   : > { %s1508_s23 = scalar_lea.hbm %s1994_s28, %s1983_s6  ;;  %s1512_s15 = scalar_lea.hbm %s2159_s0, 640 }
  0xb6   : > { %p1509_p0 = scmp.ne.s32.totalorder %s1994_s28, %s1508_s23  ;;  %p1513_p8 = scmp.lt.u32.totalorder %s1994_s28, %s2159_s0 }
  0xb7   : > { %p1514_p10 = scmp.lt.u32.totalorder %s1512_s15, %s1508_s23  ;;  %p1516_p6 = scmp.lt.u32.totalorder %s1508_s23, %s1994_s28 }
  0xb8   : > { %p1510_p1 = pnand %p1509_p0, %p1076_p9 }
  0xb9   : > { %p1515_p13 = por %p1514_p10, %p1513_p8 }
  0xba   : > { %p1511_p2 = pneg %p1510_p1 }
  0xbb   : > { %p1517_p7 = por %p1516_p6, %p1515_p13 }
  0xbd   : > { %p1518_p12 = pnand %p1517_p7, %p1511_p2 }
  0xbf   : > { %1521 = shalt.err (!%p1518_p12)
}
  0xc0   : > { %s1522_s10 = scalar_lea.vmem %s1996_s24, %s1983_s6  ;;  %s1681_s8 = smov [#allocation6]  }
  0xc1   : > { %p1523_p3 = scmp.ne.s32.totalorder %s1996_s24, %s1522_s10  ;;  %s1526_s19 = sshll.u32 %s1681_s8, 4  ;;  %s1527_s19 = int_to_ptr.vmem [resolvable:$false] %s1526_s19 }
  0xc2   : > { %s1528_s30 = scalar_lea.vmem %s1527_s19, 512  ;;  %p1529_p11 = scmp.lt.s32.totalorder %s1996_s24, %s1527_s19 }
  0xc3   : > { %p1524_p5 = pnand %p1523_p3, %p1076_p9  ;;  %p1530_p0 = scmp.lt.s32.totalorder %s1528_s30, %s1522_s10 }
  0xc5   : > { %p1525_p4 = pneg %p1524_p5  ;;  %p1531_p1 = por %p1530_p0, %p1529_p11 }
  0xc7   : > { %p1532_p8 = pnand %p1531_p1, %p1525_p4 }
  0xc9   : > { %1535 = shalt.err (!%p1532_p8)
}
  0xca   : > { %s1682_s25 = smov 128   ;;  %s1683_s17 = smov 8  }
  0xcb   : > { %308 = dma.hbm_to_vmem [thread:$0]  (%p1076_p9), %s1994_s28, %s1983_s6, %s1996_s24, %s1986_s11, %s1682_s25, %s1682_s25, %s1683_s17  }
  0xcc PF: > { %p2206_p2 = scmp.ne.s32.totalorder %s2202_s27, 0 }
  0xcd   : > { %s2207_s13 = sld [smem:[#allocation24_spill]] (!%p2206_p2)  ;;  %s2208_s14 = sld [smem:[#allocation31_spill]] (!%p2206_p2) }
  0xce   : > { %314 = sbr.rel (%p2206_p2) target bundleno = 1014 (0x3f6), region = 44 }
  0xd3   : > { %s316_s23 = sand.u32 (!%p2206_p2), 1, %s2207_s13   ;;  %p2209_p10 = scmp.ne.s32.totalorder (!%p2206_p2), %s2208_s14, 0 }
  0xd4   : > { %s2026_s9 = sshll.u32 (!%p2206_p2), %s316_s23, 4  ;;  %s317_s16 = scalar_lea.sflag (!%p2206_p2), [#allocation7], %s316_s23 }
  0xd5   : > { %s320_s15 = scalar_lea.vmem [#allocation6], %s2026_s9 }
  0xd6   : > { %1609 = dma.done.wait (%p2209_p10), %s317_s16, 256  }
  0xd7   : > { %1611 = vsyncadd (%p2209_p10), %s317_s16, 4294967040  ;;  %p2210_p9 = scmp.ne.s32.totalorder %s2192_s18, 0 }
  0xd9   : > { %1613 = dma.done.wait (%p2210_p9), [#allocation10], 2080  }
  0xda   : > { %1615 = vsyncadd (%p2210_p9), [#allocation10], 4294965216 }
  0xdb   : > { %1617 = dma.done.wait (%p2210_p9), [#allocation13], 2080  }
  0xdc   : > { %1619 = vsyncadd (%p2210_p9), [#allocation13], 4294965216 }
  0xdd   : > { %1621 = dma.done.wait (%p2210_p9), [#allocation16], 16  }
  0xde   : > { %1623 = vsyncadd (%p2210_p9), [#allocation16], 4294967280  ;;  %s366_s27 = sand.u32 1, %s1634_s22   ;;  %s2211_s28 = sld [smem:[#allocation26_spill]] }
  0xdf   : > { %s1087_s6 = sshll.u32 %s366_s27, 4 }
  0xe0   : > { %s2048_s11 = scalar_lea.vmem [#allocation17], %s1087_s6 }
  0xe4   : > { %p1088_p13 = scmp.ne.s32.totalorder %s2211_s28, 0 }
  0xe5   : > { %s2212_s24 = sld [smem:[#allocation25_spill]] (!%p1088_p13) }
  0xe6   : > { %388 = sbr.rel (%p1088_p13) target bundleno = 551 (0x227), region = 72 }
  0xeb   : > { %p1089_p6 = scmp.ne.s32.totalorder (!%p1088_p13), %s2212_s24, 0 }
  0xed   : > { %392 = sbr.rel (%p1089_p6) target bundleno = 244 (0xf4), region = 76  ;;  %v393_v0 = vlaneseq (!%p1089_p6)  ;;  %v1684_v1 = vmov (!%p1089_p6), 0.0  }
  0xef   : > { %vm395_vm0 = vcmp.lt.s32.totalorder (!%p1089_p6), %v393_v0, 256 }
  0xf0   : > { %397 = vst.msk [vmem:[#allocation3] sm:$0x3] (!%p1089_p6), %vm395_vm0, %v1684_v1  ;;  %398 = vst.msk [vmem:[#allocation4] sm:$0x3] (!%p1089_p6), %vm395_vm0, %v1684_v1 }
  0xf4 PF: > { %v1322_v2 = vld [vmem:[#allocation9 + $0x4] ss:$8 sps:$4 sm:$0xff]   ;;  %v1324_v3 = vld [vmem:[#allocation9] ss:$8 sps:$4 sm:$0xff]   ;;  %v1685_v4 = vmov 0   ;;  %s2213_s18 = sld [smem:[#allocation25_spill]]  ;;  %v541_v22 = vlaneseq }
  0xf5   : > { %530 = vmatprep.mubr.bf16.mxu0 %v1685_v4  ;;  %498 = vmatprep.subr.bf16.mxu0 %v1322_v2  ;;  %v1325_v5 = vld [vmem:[#allocation9 + $0x14] ss:$8 sps:$4 sm:$0xff]   ;;  %v1327_v6 = vld [vmem:[#allocation9 + $0x10] ss:$8 sps:$4 sm:$0xff]   ;;  %v1328_v7 = vld [vmem:[#allocation9 + $0x24] ss:$8 sps:$4 sm:$0xff]  }
  0xf6   : > { %499 = vmatpush1.bf16.msra.mxu0 %v1324_v3  ;;  %v1330_v8 = vld [vmem:[#allocation9 + $0x20] ss:$8 sps:$4 sm:$0xff]   ;;  %v1331_v9 = vld [vmem:[#allocation9 + $0x34] ss:$8 sps:$4 sm:$0xff]   ;;  %v1333_v10 = vld [vmem:[#allocation9 + $0x30] ss:$8 sps:$4 sm:$0xff]  }
  0xf7   : > { %500 = vmatprep.subr.bf16.mxu0 %v1325_v5  ;;  %v1334_v11 = vld [vmem:[#allocation9 + $0x44] ss:$8 sps:$4 sm:$0xff]   ;;  %v1336_v12 = vld [vmem:[#allocation9 + $0x40] ss:$8 sps:$4 sm:$0xff]   ;;  %v1337_v13 = vld [vmem:[#allocation9 + $0x54] ss:$8 sps:$4 sm:$0xff]  }
  0xf8   : > { %v1339_v14 = vld [vmem:[#allocation9 + $0x50] ss:$8 sps:$4 sm:$0xff]   ;;  %v1340_v15 = vld [vmem:[#allocation9 + $0x64] ss:$8 sps:$4 sm:$0xff]   ;;  %v1342_v16 = vld [vmem:[#allocation9 + $0x60] ss:$8 sps:$4 sm:$0xff]  }
  0xf9   : > { %v1343_v17 = vld [vmem:[#allocation9 + $0x74] ss:$8 sps:$4 sm:$0xff]   ;;  %v1345_v18 = vld [vmem:[#allocation9 + $0x70] ss:$8 sps:$4 sm:$0xff]   ;;  %v542_v23 = vshrl.u32 %v541_v22, 7  ;;  %vm2059_vm3 = vcmp.lt.s32.totalorder %v541_v22, 256 }
  0xfa   : > { %501 = vmatpush1.bf16.msra.mxu0 %v1327_v6  ;;  %v399_v19 = vld [vmem:[%s320_s15] sm:$0xff]  ;;  %v400_v20 = vld [vmem:[%s320_s15 + $0x8] sm:$0xff]  ;;  %s1106_s20 = sshll.u32 %s2213_s18, 4  ;;  %v1686_v50 = vmov 1966171168   ;;  %p1109_p7 = scmp.ne.s32.totalorder %s2213_s18, 2 }
  0xfb   : > { %502 = vmatprep.subr.bf16.mxu0 %v1328_v7  ;;  %v401_v21 = vpack.c.bf16 %v400_v20, %v399_v19  ;;  %v545_v24 = vstv %s1106_s20  ;;  %v543_v25 = vadd.s32 8, %v542_v23  ;;  %s636_s29 = scalar_lea.vmem [#allocation2], %s1106_s20  ;;  %v573_v51 = vunpack.c.l.s4 %v1686_v50 }
  0xfc   : > { %v546_v26 = vadd.s32 %v545_v24, %v542_v23 }
  0xfd   : > { %v547_v27 = vadd.s32 %v545_v24, %v543_v25  ;;  %v574_v60 = vunpack.c.0.s8 %v573_v51 }
  0xfe   : > { %503 = vmatpush1.bf16.msra.mxu0 %v1330_v8  ;;  %vm548_vm1 = vcmp.lt.s32.totalorder %v546_v26, 38 }
  0xff   : > { %504 = vmatprep.subr.bf16.mxu0 %v1331_v9  ;;  %vm549_vm2 = vcmp.lt.s32.totalorder %v547_v27, 38  ;;  %v577_v5 = vsub.s32 %v574_v60, %v542_v23 }
 0x102   : > { %505 = vmatpush1.bf16.msra.mxu0 %v1333_v10 }
 0x103   : > { %506 = vmatprep.subr.bf16.mxu0 %v1334_v11 }
 0x106   : > { %507 = vmatpush1.bf16.msra.mxu0 %v1336_v12 }
 0x107   : > { %508 = vmatprep.subr.bf16.mxu0 %v1337_v13  ;;  %v554_v13 = vld [vmem:[#allocation3] sm:$0x3] }
 0x10a   : > { %509 = vmatpush1.bf16.msra.mxu0 %v1339_v14 }
 0x10b   : > { %510 = vmatprep.subr.bf16.mxu0 %v1340_v15 }
 0x10e   : > { %511 = vmatpush1.bf16.msra.mxu0 %v1342_v16 }
 0x10f   : > { %512 = vmatprep.subr.bf16.mxu0 %v1343_v17  ;;  %v593_v17 = vld [vmem:[#allocation4] sm:$0x3] }
 0x112   : > { %513 = vmatpush1.bf16.msra.mxu0 %v1345_v18 }
 0x115   : > { %531 = vmatmul.mubr.bf16.vlgmr.msra.gmra.mrb[0].mxu0 %v401_v21 }
 0x1e8   : > { %v532_v28 = vpop.f32.mrb[0].mxu0 }
 0x1e9   : > { %v550_v29 = vsel %vm548_vm1, %v532_v28, 0.0  ;;  %v534_v30 = vpop.f32.mrb[1].mxu0 }
 0x1ea   : > { %v551_v31 = vsel %vm548_vm1, %v534_v30, 0.0  ;;  %v536_v32 = vpop.f32.mrb[2].mxu0  ;;  %v594_v33 = vmul.f32 %v550_v29, %v550_v29 }
 0x1eb   : > { %v632_v34 = vpack.c.bf16 %v536_v32, %v532_v28  ;;  %v538_v35 = vpop.f32.mrb[3].mxu0  ;;  %v552_v36 = vsel %vm549_vm2, %v536_v32, 0.0  ;;  %v595_v41 = vmul.f32 %v551_v31, %v551_v31  ;;  %v655_v32 = vld [vmem:[#allocation12] sm:$0x3] (!%p1109_p7) }
 0x1ec   : > { %v553_v37 = vsel %vm549_vm2, %v538_v35, 0.0  ;;  %v555_v38 = vadd.f32 %v552_v36, %v550_v29  ;;  %v596_v39 = vmul.f32 %v552_v36, %v552_v36  ;;  %v633_v40 = vpack.c.bf16 %v538_v35, %v534_v30  ;;  %v650_v29 = vld [vmem:[#allocation11] sm:$0x3] (!%p1109_p7) }
 0x1ed   : > { %v562_v42 = vadd.f32 %v553_v37, %v551_v31  ;;  %v597_v43 = vmul.f32 %v553_v37, %v553_v37  ;;  %637 = vst [vmem:[%s636_s29] sm:$0xff] %v632_v34 }
 0x1ee   : > { %v556_v44 = vrot.slane %v555_v38, 4  ;;  %v598_v45 = vadd.f32 %v596_v39, %v594_v33  ;;  %638 = vst [vmem:[%s636_s29 + $0x8] sm:$0xff] %v633_v40 }
 0x1ef   : > { %v563_v46 = vrot.slane %v562_v42, 4  ;;  %v605_v47 = vadd.f32 %v597_v43, %v595_v41 }
 0x1f0   : > { %v557_v48 = vadd.f32 %v556_v44, %v555_v38  ;;  %v599_v49 = vrot.slane %v598_v45, 4 }
 0x1f1   : > { %v564_v52 = vadd.f32 %v563_v46, %v562_v42  ;;  %v606_v53 = vrot.slane %v605_v47, 4 }
 0x1f2   : > { %v558_v54 = vrot.slane %v557_v48, 2  ;;  %v600_v55 = vadd.f32 %v599_v49, %v598_v45 }
 0x1f3   : > { %v565_v56 = vrot.slane %v564_v52, 2  ;;  %v607_v57 = vadd.f32 %v606_v53, %v605_v47 }
 0x1f4   : > { %v559_v58 = vadd.f32 %v558_v54, %v557_v48  ;;  %v601_v59 = vrot.slane %v600_v55, 2 }
 0x1f5   : > { %v566_v61 = vadd.f32 %v565_v56, %v564_v52  ;;  %v608_v62 = vrot.slane %v607_v57, 2 }
 0x1f6   : > { %v560_v63 = vrot.slane %v559_v58, 1  ;;  %v602_v0 = vadd.f32 %v601_v59, %v600_v55 }
 0x1f7   : > { %v567_v1 = vrot.slane %v566_v61, 1  ;;  %v609_v2 = vadd.f32 %v608_v62, %v607_v57 }
 0x1f8   : > { %v561_v3 = vadd.f32 %v560_v63, %v559_v58  ;;  %v603_v4 = vrot.slane %v602_v0, 1 }
 0x1f9   : > { %v568_v6 = vadd.f32 %v567_v1, %v566_v61  ;;  %v610_v7 = vrot.slane %v609_v2, 1 }
 0x1fa   : > { %v604_v8 = vadd.f32 %v603_v4, %v602_v0 }
 0x1fb   : > { %v571_v9 = vcombine.low %v561_v3, %v568_v6  ;;  %v611_v10 = vadd.f32 %v610_v7, %v609_v2 }
 0x1fd   : > { %v578_v11 = vrot.slane %v571_v9, %v577_v5  ;;  %v614_v12 = vcombine.low %v604_v8, %v611_v10 }
 0x1ff   : > { %v585_v14 = vrot.slane %v578_v11, %v577_v5  ;;  %v621_v15 = vrot.slane %v614_v12, %v577_v5  ;;  %642 = sbr.rel (%p1109_p7) target bundleno = 551 (0x227), region = 80 }
 0x201   : > { %v587_v18 = vadd.f32 %v585_v14, %v554_v13  ;;  %v628_v19 = vrot.slane %v621_v15, %v577_v5 }
 0x203   : > { %592 = vst.msk [vmem:[#allocation3] sm:$0x3] %vm2059_vm3, %v587_v18  ;;  %v630_v20 = vadd.f32 %v628_v19, %v593_v17 }
 0x205   : > { %631 = vst.msk [vmem:[#allocation4] sm:$0x3] %vm2059_vm3, %v630_v20 }
 0x20a   : > { %v643_v21 = vld [vmem:[#allocation3] sm:$0x3] }
 0x20b   : > { %v644_v24 = vmul.f32 0.02631579, %v643_v21 }
 0x20c   : > { %v645_v23 = vld [vmem:[#allocation4] sm:$0x3] }
 0x20d   : > { %v646_v22 = vmul.f32 0.02631579, %v645_v23  ;;  %v647_v25 = vmul.f32 %v644_v24, %v644_v24 }
 0x20f   : > { %v648_v26 = vsub.f32 %v646_v22, %v647_v25 }
 0x211   : > { %v649_v27 = vmax.f32 %v648_v26, 0.0 }
 0x213   : > { %v651_v28 = vadd.f32 1e-05, %v649_v27 }
 0x215   : > { %1346 = vrsqrt.f32 %v651_v28 }
 0x21f   : > { %v1347_v30 = vpop.eup %1346 }
 0x220   : > { %v653_v31 = vmul.f32 %v1347_v30, %v650_v29 }
 0x222   : > { %654 = vst.msk [vmem:[#allocation5] ss:$2 sm:$0x3] %vm2059_vm3, %v653_v31  ;;  %v656_v33 = vmul.f32 %v653_v31, %v644_v24 }
 0x224   : > { %v657_v34 = vsub.f32 %v655_v32, %v656_v33 }
 0x226   : > { %659 = vst.msk [vmem:[#allocation5 + $0x1] ss:$2 sm:$0x3] %vm2059_vm3, %v657_v34 }
 0x227 PF: > { %s2216_s10 = sld [smem:[#allocation26_spill]] }
 0x22d   : > { %p1110_p12 = scmp.ne.s32.totalorder %s2216_s10, 1 }
 0x22e   : > { %v1348_v35 = vld [vmem:[#allocation14 + $0x40] sm:$0xff] (!%p1110_p12)   ;;  %s2217_s8 = sld [smem:[#allocation25_spill]] (!%p1110_p12)  ;;  %v1350_v37 = vld [vmem:[#allocation14 + $0x48] sm:$0xff] (!%p1110_p12)   ;;  %v1352_v39 = vld [vmem:[#allocation14 + $0x50] sm:$0xff] (!%p1110_p12)   ;;  %v675_v40 = vlaneseq (!%p1110_p12) }
 0x22f   : > { %663 = sbr.rel (%p1110_p12) target bundleno = 972 (0x3cc), region = 84  ;;  %v1349_v36 = vld [vmem:[#allocation14] sm:$0xff] (!%p1110_p12)   ;;  %1143 = vmatprep.subr.bf16.mxu0 (!%p1110_p12), %v1348_v35  ;;  %v1351_v38 = vld [vmem:[#allocation14 + $0x8] sm:$0xff] (!%p1110_p12)   ;;  %v1353_v41 = vld [vmem:[#allocation14 + $0x10] sm:$0xff] (!%p1110_p12)  }
 0x230   : > { %1144 = vmatpush3.bf16.msra.mxu0 (!%p1110_p12), %v1349_v36  ;;  %v1354_v42 = vld [vmem:[#allocation14 + $0x58] sm:$0xff] (!%p1110_p12)   ;;  %v676_v43 = vshrl.u32 (!%p1110_p12), %v675_v40, 7  ;;  %v1356_v45 = vld [vmem:[#allocation14 + $0x60] sm:$0xff] (!%p1110_p12)   ;;  %v1358_v49 = vld [vmem:[#allocation14 + $0x68] sm:$0xff] (!%p1110_p12)  }
 0x231   : > { %1145 = vmatprep.subr.bf16.mxu0 (!%p1110_p12), %v1350_v37  ;;  %v1355_v44 = vld [vmem:[#allocation14 + $0x18] sm:$0xff] (!%p1110_p12)   ;;  %v1357_v48 = vld [vmem:[#allocation14 + $0x20] sm:$0xff] (!%p1110_p12)   ;;  %v1359_v62 = vld [vmem:[#allocation14 + $0x28] sm:$0xff] (!%p1110_p12)  }
 0x232   : > { %v677_v46 = vsub.s32 (!%p1110_p12), 0, %v676_v43  ;;  %v681_v47 = vsub.s32 (!%p1110_p12), 1, %v676_v43  ;;  %v673_v52 = vld [vmem:[#allocation5] ss:$2 sm:$0x3] (!%p1110_p12)  ;;  %v1360_v1 = vld [vmem:[#allocation14 + $0x70] sm:$0xff] (!%p1110_p12)  }
 0x233   : > { %v690_v57 = vld [vmem:[#allocation5 + $0x1] ss:$2 sm:$0x3] (!%p1110_p12)  ;;  %v1361_v8 = vld [vmem:[#allocation14 + $0x30] sm:$0xff] (!%p1110_p12)   ;;  %v1113_v19 = vld [vmem:[#allocation15] ss:$0 sm:$0xff] (!%p1110_p12) }
 0x234   : > { %1146 = vmatpush3.bf16.msra.mxu0 (!%p1110_p12), %v1351_v38  ;;  %s1141_s19 = sshll.u32 (!%p1110_p12), %s2217_s8, 4  ;;  %v678_v55 = vrot.slane (!%p1110_p12), %v673_v52, %v677_v46  ;;  %v682_v56 = vrot.slane (!%p1110_p12), %v673_v52, %v681_v47  ;;  %v695_v58 = vrot.slane (!%p1110_p12), %v690_v57, %v677_v46  ;;  %v699_v59 = vrot.slane (!%p1110_p12), %v690_v57, %v681_v47  ;;  %v1362_v11 = vld [vmem:[#allocation14 + $0x78] sm:$0xff] (!%p1110_p12)  }
 0x235   : > { %1147 = vmatprep.subr.bf16.mxu0 (!%p1110_p12), %v1352_v39  ;;  %s666_s30 = scalar_lea.vmem (!%p1110_p12), [#allocation2], %s1141_s19  ;;  %v1363_v15 = vld [vmem:[#allocation14 + $0x38] sm:$0xff] (!%p1110_p12)  }
 0x236   : > { %v667_v50 = vld [vmem:[%s666_s30] sm:$0xff]  ;;  %v668_v51 = vld [vmem:[%s666_s30 + $0x8] sm:$0xff] }
 0x237   : > { %v670_v53 = vunpack.c.l.bf16 %v668_v51  ;;  %v672_v54 = vunpack.c.h.bf16 %v668_v51  ;;  %v669_v60 = vunpack.c.l.bf16 %v667_v50  ;;  %v671_v61 = vunpack.c.h.bf16 %v667_v50 }
 0x238   : > { %1148 = vmatpush3.bf16.msra.mxu0 %v1353_v41 }
 0x239   : > { %1149 = vmatprep.subr.bf16.mxu0 %v1354_v42  ;;  %v686_v63 = vmul.f32 %v682_v56, %v670_v53  ;;  %v688_v0 = vmul.f32 %v682_v56, %v672_v54  ;;  %v685_v2 = vmul.f32 %v678_v55, %v669_v60  ;;  %v687_v3 = vmul.f32 %v678_v55, %v671_v61 }
 0x23b   : > { %v703_v4 = vadd.f32 %v699_v59, %v686_v63  ;;  %v705_v5 = vadd.f32 %v699_v59, %v688_v0  ;;  %v702_v6 = vadd.f32 %v695_v58, %v685_v2  ;;  %v704_v7 = vadd.f32 %v695_v58, %v687_v3 }
 0x23c   : > { %1150 = vmatpush3.bf16.msra.mxu0 %v1355_v44 }
 0x23d   : > { %1151 = vmatprep.subr.bf16.mxu0 %v1356_v45  ;;  %v707_v9 = vmax.f32 %v703_v4, 0.0  ;;  %v709_v10 = vmax.f32 %v705_v5, 0.0  ;;  %v706_v13 = vmax.f32 %v702_v6, 0.0  ;;  %v708_v14 = vmax.f32 %v704_v7, 0.0 }
 0x23f   : > { %v711_v12 = vpack.c.bf16 %v709_v10, %v707_v9  ;;  %v710_v16 = vpack.c.bf16 %v708_v14, %v706_v13 }
 0x240   : > { %1152 = vmatpush3.bf16.msra.mxu0 %v1357_v48 }
 0x241   : > { %1153 = vmatprep.subr.bf16.mxu0 %v1358_v49  ;;  %879 = vmatprep.mubr.bf16.mxu0 %v711_v12 }
 0x244   : > { %1154 = vmatpush3.bf16.msra.mxu0 %v1359_v62 }
 0x245   : > { %1155 = vmatprep.subr.bf16.mxu0 %v1360_v1 }
 0x248   : > { %1156 = vmatpush3.bf16.msra.mxu0 %v1361_v8 }
 0x249   : > { %1157 = vmatprep.subr.bf16.mxu0 %v1362_v11 }
 0x24c   : > { %1158 = vmatpush3.bf16.msra.mxu0 %v1363_v15 }
 0x24f   : > { %880 = vmatmul.mubr.bf16.vlgmr.msra.gmra.mrb[0].mxu0 %v710_v16 }
 0x322   : > { %v1159_v17 = vpop.f32.mrb[0].mxu0 }
 0x323   : > { %v1160_v18 = vpop.f32.mrb[1].mxu0 }
 0x324   : > { %v1161_v20 = vadd.f32 %v1160_v18, %v1159_v17  ;;  %v1162_v21 = vpop.f32.mrb[2].mxu0 }
 0x325   : > { %v1163_v23 = vpop.f32.mrb[3].mxu0 }
 0x326   : > { %v1164_v24 = vadd.f32 %v1163_v23, %v1162_v21  ;;  %v882_v22 = vadd.f32 %v1161_v20, %v1113_v19 }
 0x328   : > { %v885_v25 = vadd.f32 %v1164_v24, %v1113_v19  ;;  %v888_v26 = vmul.f32 %v882_v22, %v882_v22 }
 0x32a   : > { %890 = vadd.xlane.f32.xlu0 %v888_v26  ;;  %v889_v27 = vmul.f32 %v885_v25, %v885_v25 }
 0x32e   : > { %892 = vadd.xlane.f32.xlu0 %v889_v27 }
 0x3b7   : > { %v891_v28 = vpop.xlane.xlu0 %890 }
 0x3b8   : > { %v894_v29 = vmax.f32 %v891_v28, 1e-24 }
 0x3ba   : > { %1364 = vrsqrt.f32 %v894_v29 }
 0x3bb   : > { %v893_v30 = vpop.xlane.xlu0 %892 }
 0x3bc   : > { %v895_v31 = vmax.f32 %v893_v30, 1e-24 }
 0x3be   : > { %1366 = vrsqrt.f32 %v895_v31 }
 0x3c4   : > { %v1365_v32 = vpop.eup %1364 }
 0x3c5   : > { %v898_v33 = vmul.f32 %v1365_v32, %v882_v22 }
 0x3c7   : > { %900 = vst [vmem:[%s2048_s11] sm:$0xff] %v898_v33 }
 0x3c8   : > { %v1367_v34 = vpop.eup %1366 }
 0x3c9   : > { %v899_v35 = vmul.f32 %v1367_v34, %v885_v25 }
 0x3cb   : > { %901 = vst [vmem:[%s2048_s11 + $0x8] sm:$0xff] %v899_v35 }
 0x3cc PF: > { %s2078_s25 = scalar_lea.sflag [#allocation8], %s366_s27  ;;  %p2218_p3 = scmp.ne.s32.totalorder %s2198_s12, 0 }
 0x3cd   : > { %s2219_s17 = sld [smem:[#allocation26_spill]] (%p2218_p3)  ;;  %s2220_s13 = sld [smem:[#allocation25_spill]] (%p2218_p3) }
 0x3ce   : > { %909 = sbr.rel (!%p2218_p3) target bundleno = 1014 (0x3f6), region = 88 }
 0x3d3   : > { %s910_s14 = smul.u32 (%p2218_p3), %s2220_s13, %s2219_s17 }
 0x3d5   : > { %s1131_s23 = sshll.u32 %s910_s14, 1 }
 0x3d6   : > { %s912_s9 = ssub.s32 5, %s1131_s23 }
 0x3d7   : > { %p913_p5 = scmp.lt.s32.totalorder %s912_s9, 2 }
 0x3d9   : > { %s2247_s9 = smov (!%p913_p5, %s912_s9), 2 }
 0x3da   : > { %s2084_s16 = sshll.u32 %s2247_s9, 7 }
 0x3db   : > { %s917_s15 = ssub.s32 256, %s2084_s16 }
 0x3dc   : > { %918 = vsyncadd %s2078_s25, %s917_s15  ;;  %p1133_p4 = scmp.ne.s32.totalorder %s2084_s16, 0  ;;  %s1142_s12 = sshll.u32 %s910_s14, 8 }
 0x3dd   : > { %s2221_s28 = sld [smem:[#allocation35_spill]]  ;;  %s923_s20 = sshll.u32 %s2048_s11, 4  ;;  %s2095_s20 = int_to_ptr.vmem [resolvable:$true] %s923_s20 }
 0x3de   : > { %s1536_s29 = scalar_lea.vmem %s2095_s20, %s2084_s16  ;;  %s1687_s10 = smov [#allocation17]  }
 0x3df   : > { %p1537_p11 = scmp.ne.s32.totalorder %s2095_s20, %s1536_s29  ;;  %s1540_s8 = sshll.u32 %s1687_s10, 4  ;;  %s1541_s8 = int_to_ptr.vmem [resolvable:$false] %s1540_s8 }
 0x3e0   : > { %s1542_s19 = scalar_lea.vmem %s1541_s8, 512  ;;  %p1543_p8 = scmp.lt.s32.totalorder %s2095_s20, %s1541_s8 }
 0x3e1   : > { %p1538_p0 = pnand %p1537_p11, %p1133_p4  ;;  %p1544_p2 = scmp.lt.s32.totalorder %s1542_s19, %s1536_s29 }
 0x3e3   : > { %s2222_s18 = smov %s2221_s28  ;;  %s2092_s24 = scalar_lea.hbm %s2221_s28, %s1142_s12 }
 0x3e4   : > { %p1539_p1 = pneg %p1538_p0  ;;  %p1545_p10 = por %p1544_p2, %p1543_p8 }
 0x3e6   : > { %p1546_p9 = pnand %p1545_p10, %p1539_p1 }
 0x3e8   : > { %1549 = shalt.err (!%p1546_p9)
}
 0x3e9   : > { %s1550_s11 = scalar_lea.hbm %s2092_s24, %s2084_s16  ;;  %s1554_s13 = scalar_lea.hbm %s2222_s18, 640 }
 0x3ea   : > { %p1551_p13 = scmp.ne.s32.totalorder %s2092_s24, %s1550_s11  ;;  %p1555_p12 = scmp.lt.u32.totalorder %s2092_s24, %s2222_s18 }
 0x3eb   : > { %p1556_p3 = scmp.lt.u32.totalorder %s1554_s13, %s1550_s11  ;;  %p1558_p11 = scmp.lt.u32.totalorder %s1550_s11, %s2092_s24 }
 0x3ec   : > { %p1552_p6 = pnand %p1551_p13, %p1133_p4 }
 0x3ed   : > { %p1557_p5 = por %p1556_p3, %p1555_p12 }
 0x3ee   : > { %p1553_p7 = pneg %p1552_p6 }
 0x3ef   : > { %p1559_p0 = por %p1558_p11, %p1557_p5 }
 0x3f1   : > { %p1560_p1 = pnand %p1559_p0, %p1553_p7 }
 0x3f3   : > { %1563 = shalt.err (!%p1560_p1)
}
 0x3f4   : > { %s1688_s9 = smov 128   ;;  %s1689_s15 = smov 8  }
 0x3f5   : > { %929 = dma.vmem_to_hbm [thread:$0]  (%p1133_p4), %s2095_s20, %s2084_s16, %s2092_s24, %s2078_s25, %s1688_s9, %s1688_s9, %s1689_s15  }
 0x3f6 PF: > { %s2223_s12 = sld [smem:[#allocation34_spill]]  ;;  %p1217_p8 = scmp.ge.s32.totalorder %s1670_s7, 2 }
 0x3f7   : > { %s938_s27 = sand.u32 1, %s1630_s21  }
 0x3f8   : > { %s939_s6 = scalar_lea.sflag [#allocation8], %s938_s27 }
 0x3fc   : > { %p2224_p2 = scmp.ne.s32.totalorder %s2223_s12, 0 }
 0x3fe   : > { %p1204_p10 = pnand %p1217_p8, %p2224_p2 }
 0x400   : > { %1625 = dma.done.wait (!%p1204_p10), %s939_s6, 256  }
 0x401   : > { %1627 = vsyncadd (!%p1204_p10), %s939_s6, 4294967040  ;;  %s25_s7 = sadd.s32 1, %s1670_s7   ;;  %s2225_s28 = sld [smem:[#allocation23_spill]] }
 0x402   : > { %p22_p9 = scmp.ge.s32.totalorder %s25_s7, 8   ;;  %s2226_s23 = sld [smem:[#allocation33_spill]] }
 0x403   : > { %s2227_s24 = sld [smem:[#allocation24_spill]]  ;;  %s2228_s16 = sld [smem:[#allocation32_spill]] }
 0x404   : > { %s2229_s27 = sld [smem:[#allocation27_spill]]  ;;  %s2230_s20 = sld [smem:[#allocation28_spill]] }
 0x405   : > { %s2231_s29 = sld [smem:[#allocation29_spill]]  ;;  %s2232_s30 = sld [smem:[#allocation30_spill]] }
 0x406   : > { %s2233_s21 = smov %s1634_s22  ;;  %s2235_s25 = smov %s1650_s26 }
 0x407   : > { %s2234_s22 = smov %s2225_s28  ;;  %24 = sbr.rel (!%p22_p9) target bundleno = 14 (0xe), region = 129 }
 0x409   : > { %s2236_s26 = smov %s2228_s16 }
 0x40a   : > { %s2237_s28 = smov %s2230_s20 }
 0x40e   :  { %944 = vsyncpa [#allocation7], 1 }
 0x40f   :  { %946 = vsyncpa [#allocation7 + $0x1], 1 }
 0x410   :  { %947 = vsyncpa [#allocation10], 1 }
 0x411   :  { %948 = vsyncpa [#allocation13], 1 }
 0x412   :  { %949 = vsyncpa [#allocation16], 1 }
 0x413   :  { %950 = vsyncpa [#allocation8], 1 }
 0x414   :  { %952 = vsyncpa [#allocation8 + $0x1], 1 }

</bundles_post_ra>
